<compile_context>
chip_gen: v5e
topology: v5e:2x2
jax: 0.10.0
libtpu: 0.0.40
codegen_flags: <defaults>
</compile_context>

<pallas_src>
import numpy as np
import jax
import jax.numpy as jnp
from jax.experimental import pallas as pl
from jax.experimental.pallas import tpu as pltpu


def _make_transition_kernel(compute_dtype):
    def kernel(x_ref, scale_ref, bias_ref, w_ref, cb_ref, o_ref):
        # x_ref:    (4, TM, Cin) bf16  four 2x2-pool phases of TM output pixels
        # scale_ref:(1, Cin)  compute_dtype  gamma / sqrt(var + eps)
        # bias_ref: (1, Cin)  compute_dtype  beta - mean * scale
        # w_ref:    (Cin, Cout) bf16   1x1 conv weight * 0.25 (pool folded)
        # cb_ref:   (1, Cout) f32      conv bias (added after pool+conv)
        # o_ref:    (TM, Cout) f32
        scale = scale_ref[...]
        bias = bias_ref[...]
        # 2x2 average pool of ReLU(BN(x)) = three adds over the 4 phases
        # (the 0.25 factor lives in w_ref).
        acc = jnp.maximum(x_ref[0].astype(compute_dtype) * scale + bias, 0.0)
        for p in range(1, 4):
            acc = acc + jnp.maximum(
                x_ref[p].astype(compute_dtype) * scale + bias, 0.0)
        # 1x1 conv on pooled activations: bf16 MXU inputs, f32 accumulation.
        y = jnp.dot(acc.astype(jnp.bfloat16), w_ref[...],
                    preferred_element_type=jnp.float32)
        o_ref[...] = y + cb_ref[...]
    return kernel


def _device_flags():
    """(bf16 VALU available, per-block VMEM byte budget)."""
    kind = ""
    try:
        kind = jax.devices()[0].device_kind.lower()
    except Exception:
        pass
    bf16_valu = ("v6" in kind) or ("v7" in kind)
    budget = (6 << 20) if "v7" in kind else (8 << 20)   # v7x has 64 MiB VMEM
    return bf16_valu, budget


def _pick_tile_m(M, Cin, x_itemsize, budget_bytes):
    """Tile along M = N*Ho*Wo: multiple of 16, VMEM-aware; caller pads M."""
    budget_rows = max(16, budget_bytes // (4 * x_itemsize * max(Cin, 1)))
    candidates = (2048, 1024, 768, 512, 384, 256, 192, 128, 112, 96, 64, 32, 16)
    feasible = [tm for tm in candidates if tm <= budget_rows] or [16]

    def pad_of(tm):
        steps = -(-M // tm)
        return steps * tm - M, steps

    # Prefer large tiles that still give >= 8 grid steps (keeps both v7x
    # TensorCores busy on the "parallel" axis) with < ~12.5% padding waste.
    for tm in feasible:
        pad, steps = pad_of(tm)
        if tm >= 256 and steps >= 8 and pad * 8 <= M:
            return tm
    # Otherwise the biggest tile with small padding waste.
    for tm in feasible:
        pad, _ = pad_of(tm)
        if pad * 8 <= M:
            return tm
    # Last resort: smallest tile (padding < 16 rows).
    return feasible[-1]


def transition_layer(x_nchw, gamma, beta, running_mean, running_var,
                     conv_w, conv_b, eps=1e-5):
    """Forward pass of TransitionLayer. Input/output are NCHW, float32."""
    N, Cin, H, W = x_nchw.shape
    Cout = conv_w.shape[0]
    # TODO(synk): odd H/W (PyTorch AvgPool2d truncates) not handled.
    assert H % 2 == 0 and W % 2 == 0
    Ho, Wo = H // 2, W // 2
    M = N * Ho * Wo

    bf16_valu, budget_bytes = _device_flags()
    compute_dtype = jnp.bfloat16 if bf16_valu else jnp.float32

    # Fold eval-mode BatchNorm into per-channel affine (computed in f32).
    scale = (gamma / jnp.sqrt(running_var + eps)).astype(jnp.float32)  # (Cin,)
    bias = (beta - running_mean * scale).astype(jnp.float32)           # (Cin,)

    # NCHW -> (4, M, Cin): split the four 2x2 pooling phases as part of the
    # one channels-last transpose.  Stored in bf16 (kernel is HBM-bound).
    xp = x_nchw.reshape(N, Cin, Ho, 2, Wo, 2)
    xp = jnp.transpose(xp, (3, 5, 0, 2, 4, 1))         # (2, 2, N, Ho, Wo, Cin)
    xp = xp.reshape(4, M, Cin).astype(jnp.bfloat16)

    TM = _pick_tile_m(M, Cin, 2, budget_bytes)
    steps = -(-M // TM)
    M_pad = steps * TM
    if M_pad != M:
        # Padded rows are junk-in, junk-out; sliced off below.
        xp = jnp.pad(xp, ((0, 0), (0, M_pad - M), (0, 0)))

    # 1x1 conv weight (Cout, Cin, 1, 1) -> (Cin, Cout); fold in the 1/4 pool
    # factor and cast to bf16 for the MXU (accumulation stays f32 in-kernel).
    w = (0.25 * jnp.transpose(conv_w.reshape(Cout, Cin), (1, 0))).astype(
        jnp.bfloat16)

    # Explicit scoped-VMEM limit: 2x double-buffered input block + 2x output
    # block + invariants + generous headroom, clamped well under v7x's 64 MiB.
    in_block = 4 * TM * Cin * 2
    out_block = TM * Cout * 4
    vmem_limit = int(min(max(2 * (in_block + out_block) + (4 << 20), 16 << 20),
                         48 << 20))

    invariant = dict(pipeline_mode=pl.Buffered(1))   # single-buffer constants
    kernel = _make_transition_kernel(compute_dtype)

    out = pl.pallas_call(
        kernel,
        out_shape=jax.ShapeDtypeStruct((M_pad, Cout), jnp.float32),
        grid_spec=pltpu.PrefetchScalarGridSpec(
            num_scalar_prefetch=0,
            grid=(steps,),
            in_specs=[
                pl.BlockSpec((4, TM, Cin), lambda i: (0, i, 0)),           # x phases
                pl.BlockSpec((1, Cin), lambda i: (0, 0), **invariant),     # bn scale
                pl.BlockSpec((1, Cin), lambda i: (0, 0), **invariant),     # bn bias
                pl.BlockSpec((Cin, Cout), lambda i: (0, 0), **invariant),  # conv w
                pl.BlockSpec((1, Cout), lambda i: (0, 0), **invariant),    # conv b
            ],
            out_specs=pl.BlockSpec((TM, Cout), lambda i: (i, 0)),
        ),
        compiler_params=pltpu.CompilerParams(
            dimension_semantics=("parallel",),
            vmem_limit_bytes=vmem_limit),
    )(xp,
      scale.reshape(1, Cin).astype(compute_dtype),
      bias.reshape(1, Cin).astype(compute_dtype),
      w,
      conv_b.reshape(1, Cout).astype(jnp.float32))

    # (M, Cout) = (N, Ho, Wo, Cout) -> NCHW (module contract is NCHW).
    out = out[:M].reshape(N, Ho, Wo, Cout)
    return jnp.transpose(out, (0, 3, 1, 2))


def _reference_forward(x, gamma, beta, rm, rv, conv_w, conv_b, eps=1e-5):
    """Pure-JAX reference matching PyTorch eval-mode TransitionLayer."""
    xh = (x - rm[None, :, None, None]) / jnp.sqrt(rv[None, :, None, None] + eps)
    h = xh * gamma[None, :, None, None] + beta[None, :, None, None]
    h = jnp.maximum(h, 0.0)
    Cout, Cin = conv_w.shape[0], conv_w.shape[1]
    y = jnp.einsum('nchw,oc->nohw', h, conv_w.reshape(Cout, Cin))
    y = y + conv_b[None, :, None, None]
    N, Co, H, W = y.shape
    return y.reshape(N, Co, H // 2, 2, W // 2, 2).mean(axis=(3, 5))


if __name__ == "__main__":
    # Small, deterministic setup consistent with TransitionLayer(in=8, out=4).
    N, Cin, Cout, H, W = 2, 8, 4, 16, 16

    key = jax.random.PRNGKey(0)
    kx, kg, kb, km, kv, kw, kcb = jax.random.split(key, 7)

    x = jax.random.normal(kx, (N, Cin, H, W), dtype=jnp.float32)

    gamma = jax.random.normal(kg, (Cin,), dtype=jnp.float32) * 0.1 + 1.0
    beta = jax.random.normal(kb, (Cin,), dtype=jnp.float32) * 0.1
    running_mean = jax.random.normal(km, (Cin,), dtype=jnp.float32) * 0.1
    running_var = jax.random.uniform(kv, (Cin,), dtype=jnp.float32,
                                     minval=0.5, maxval=1.5)

    conv_w = jax.random.normal(kw, (Cout, Cin, 1, 1), dtype=jnp.float32) * 0.1
    conv_b = jax.random.normal(kcb, (Cout,), dtype=jnp.float32) * 0.1

    out = transition_layer(x, gamma, beta, running_mean, running_var,
                           conv_w, conv_b)
    out = jax.block_until_ready(out)

    ref = _reference_forward(x, gamma, beta, running_mean, running_var,
                             conv_w, conv_b)
    ref = jax.block_until_ready(ref)

    assert out.shape == (N, Cout, H // 2, W // 2), out.shape
    # Tolerance accounts for bf16 activation storage + bf16 MXU inputs
    # (and bf16 elementwise math on v6e/v7x); accumulation is f32.
    np.testing.assert_allclose(np.asarray(out), np.asarray(ref),
                               rtol=3e-2, atol=3e-2)
    print("KERNEL_OK")
</pallas_src>

<mosaic_0001>
module attributes {stable_mosaic.version = 11 : i64} {
  func.func @kernel(%arg0: i32, %arg1: memref<4x128x8xbf16, #tpu.memory_space<vmem>>, %arg2: memref<1x8xf32, #tpu.memory_space<vmem>>, %arg3: memref<1x8xf32, #tpu.memory_space<vmem>>, %arg4: memref<8x4xbf16, #tpu.memory_space<vmem>>, %arg5: memref<1x4xf32, #tpu.memory_space<vmem>>, %arg6: memref<128x4xf32, #tpu.memory_space<vmem>>) attributes {dimension_semantics = [#tpu.dimension_semantics<parallel>], iteration_bounds = array<i64: 1>, scalar_prefetch = 0 : i64, scratch_operands = 0 : i64, tpu.core_type = #tpu.core_type<tc>, window_params = [{transform_indices = @transform_0, window_bounds = array<i64: 4, 128, 8>}, {pipeline_mode = #tpu.pipeline_mode<synchronous>, transform_indices = @transform_1, window_bounds = array<i64: 1, 8>}, {pipeline_mode = #tpu.pipeline_mode<synchronous>, transform_indices = @transform_2, window_bounds = array<i64: 1, 8>}, {pipeline_mode = #tpu.pipeline_mode<synchronous>, transform_indices = @transform_3, window_bounds = array<i64: 8, 4>}, {pipeline_mode = #tpu.pipeline_mode<synchronous>, transform_indices = @transform_4, window_bounds = array<i64: 1, 4>}, {transform_indices = @transform_5, window_bounds = array<i64: 128, 4>}]} {
    %c0 = arith.constant 0 : index
    %c0_0 = arith.constant 0 : index
    %0 = vector.load %arg2[%c0, %c0_0] : memref<1x8xf32, #tpu.memory_space<vmem>>, vector<1x8xf32>
    %c0_1 = arith.constant 0 : index
    %c0_2 = arith.constant 0 : index
    %1 = vector.load %arg3[%c0_1, %c0_2] : memref<1x8xf32, #tpu.memory_space<vmem>>, vector<1x8xf32>
    %c0_3 = arith.constant 0 : index
    %c0_4 = arith.constant 0 : index
    %c0_5 = arith.constant 0 : index
    %2 = vector.load %arg1[%c0_3, %c0_4, %c0_5] : memref<4x128x8xbf16, #tpu.memory_space<vmem>>, vector<1x128x8xbf16>
    %3 = vector.shape_cast %2 : vector<1x128x8xbf16> to vector<128x8xbf16>
    %4 = arith.extf %3 : vector<128x8xbf16> to vector<128x8xf32>
    %5 = vector.broadcast %0 : vector<1x8xf32> to vector<128x8xf32>
    %6 = arith.mulf %4, %5 : vector<128x8xf32>
    %7 = vector.broadcast %1 : vector<1x8xf32> to vector<128x8xf32>
    %8 = arith.addf %6, %7 : vector<128x8xf32>
    %cst = arith.constant 0.000000e+00 : f32
    %9 = vector.broadcast %cst : f32 to vector<128x8xf32>
    %10 = arith.maximumf %8, %9 : vector<128x8xf32>
    %c1 = arith.constant 1 : index
    %c0_6 = arith.constant 0 : index
    %c0_7 = arith.constant 0 : index
    %11 = vector.load %arg1[%c1, %c0_6, %c0_7] : memref<4x128x8xbf16, #tpu.memory_space<vmem>>, vector<1x128x8xbf16>
    %12 = vector.shape_cast %11 : vector<1x128x8xbf16> to vector<128x8xbf16>
    %13 = arith.extf %12 : vector<128x8xbf16> to vector<128x8xf32>
    %14 = vector.broadcast %0 : vector<1x8xf32> to vector<128x8xf32>
    %15 = arith.mulf %13, %14 : vector<128x8xf32>
    %16 = vector.broadcast %1 : vector<1x8xf32> to vector<128x8xf32>
    %17 = arith.addf %15, %16 : vector<128x8xf32>
    %cst_8 = arith.constant 0.000000e+00 : f32
    %18 = vector.broadcast %cst_8 : f32 to vector<128x8xf32>
    %19 = arith.maximumf %17, %18 : vector<128x8xf32>
    %20 = arith.addf %10, %19 : vector<128x8xf32>
    %c2 = arith.constant 2 : index
    %c0_9 = arith.constant 0 : index
    %c0_10 = arith.constant 0 : index
    %21 = vector.load %arg1[%c2, %c0_9, %c0_10] : memref<4x128x8xbf16, #tpu.memory_space<vmem>>, vector<1x128x8xbf16>
    %22 = vector.shape_cast %21 : vector<1x128x8xbf16> to vector<128x8xbf16>
    %23 = arith.extf %22 : vector<128x8xbf16> to vector<128x8xf32>
    %24 = vector.broadcast %0 : vector<1x8xf32> to vector<128x8xf32>
    %25 = arith.mulf %23, %24 : vector<128x8xf32>
    %26 = vector.broadcast %1 : vector<1x8xf32> to vector<128x8xf32>
    %27 = arith.addf %25, %26 : vector<128x8xf32>
    %cst_11 = arith.constant 0.000000e+00 : f32
    %28 = vector.broadcast %cst_11 : f32 to vector<128x8xf32>
    %29 = arith.maximumf %27, %28 : vector<128x8xf32>
    %30 = arith.addf %20, %29 : vector<128x8xf32>
    %c3 = arith.constant 3 : index
    %c0_12 = arith.constant 0 : index
    %c0_13 = arith.constant 0 : index
    %31 = vector.load %arg1[%c3, %c0_12, %c0_13] : memref<4x128x8xbf16, #tpu.memory_space<vmem>>, vector<1x128x8xbf16>
    %32 = vector.shape_cast %31 : vector<1x128x8xbf16> to vector<128x8xbf16>
    %33 = arith.extf %32 : vector<128x8xbf16> to vector<128x8xf32>
    %34 = vector.broadcast %0 : vector<1x8xf32> to vector<128x8xf32>
    %35 = arith.mulf %33, %34 : vector<128x8xf32>
    %36 = vector.broadcast %1 : vector<1x8xf32> to vector<128x8xf32>
    %37 = arith.addf %35, %36 : vector<128x8xf32>
    %cst_14 = arith.constant 0.000000e+00 : f32
    %38 = vector.broadcast %cst_14 : f32 to vector<128x8xf32>
    %39 = arith.maximumf %37, %38 : vector<128x8xf32>
    %40 = arith.addf %30, %39 : vector<128x8xf32>
    %41 = arith.truncf %40 : vector<128x8xf32> to vector<128x8xbf16>
    %c0_15 = arith.constant 0 : index
    %c0_16 = arith.constant 0 : index
    %42 = vector.load %arg4[%c0_15, %c0_16] : memref<8x4xbf16, #tpu.memory_space<vmem>>, vector<8x4xbf16>
    %cst_17 = arith.constant dense<0.000000e+00> : vector<128x4xf32>
    %43 = tpu.matmul %41, %42, %cst_17 {dimension_numbers = #tpu.dot_dimension_numbers<[1], [0], [0], [1], [0, 0, 1, 1], [], []>} : vector<128x8xbf16>, vector<8x4xbf16>, vector<128x4xf32> -> vector<128x4xf32>
    %c0_18 = arith.constant 0 : index
    %c0_19 = arith.constant 0 : index
    %44 = vector.load %arg5[%c0_18, %c0_19] : memref<1x4xf32, #tpu.memory_space<vmem>>, vector<1x4xf32>
    %45 = vector.broadcast %44 : vector<1x4xf32> to vector<128x4xf32>
    %46 = arith.addf %43, %45 : vector<128x4xf32>
    %c0_20 = arith.constant 0 : index
    %c0_21 = arith.constant 0 : index
    %47 = vector.load %arg6[%c0_20, %c0_21] : memref<128x4xf32, #tpu.memory_space<vmem>>, vector<128x4xf32>
    tpu.vector_store %arg6[%c0_20, %c0_21], %46 {strides = array<i32>} : memref<128x4xf32, #tpu.memory_space<vmem>>, vector<128x4xf32>,
    return
  }
  func.func @transform_0(%arg0: i32) -> (i32, i32, i32) {
    %c0_i32 = arith.constant 0 : i32
    %c0_i32_0 = arith.constant 0 : i32
    %c0_i32_1 = arith.constant 0 : i32
    return %c0_i32, %arg0, %c0_i32_0 : i32, i32, i32
  }
  func.func @transform_1(%arg0: i32) -> (i32, i32) {
    %c0_i32 = arith.constant 0 : i32
    %c0_i32_0 = arith.constant 0 : i32
    %c0_i32_1 = arith.constant 0 : i32
    return %c0_i32, %c0_i32_0 : i32, i32
  }
  func.func @transform_2(%arg0: i32) -> (i32, i32) {
    %c0_i32 = arith.constant 0 : i32
    %c0_i32_0 = arith.constant 0 : i32
    %c0_i32_1 = arith.constant 0 : i32
    return %c0_i32, %c0_i32_0 : i32, i32
  }
  func.func @transform_3(%arg0: i32) -> (i32, i32) {
    %c0_i32 = arith.constant 0 : i32
    %c0_i32_0 = arith.constant 0 : i32
    %c0_i32_1 = arith.constant 0 : i32
    return %c0_i32, %c0_i32_0 : i32, i32
  }
  func.func @transform_4(%arg0: i32) -> (i32, i32) {
    %c0_i32 = arith.constant 0 : i32
    %c0_i32_0 = arith.constant 0 : i32
    %c0_i32_1 = arith.constant 0 : i32
    return %c0_i32, %c0_i32_0 : i32, i32
  }
  func.func @transform_5(%arg0: i32) -> (i32, i32) {
    %c0_i32 = arith.constant 0 : i32
    %c0_i32_0 = arith.constant 0 : i32
    return %arg0, %c0_i32 : i32, i32
  }
}

</mosaic_0001>

<bundles_post_ra>
// kernel: tpu_custom_call.1
= control target key start
LH: loop header
LB: loop body
LE: loop exit
PB: predicated region body
PF: predicated region fallthrough
CT: control target
= control target key end

     0   :  { %vm438_vm0 = vcmask 1043456   ;;  %vm413_vm1 = vcmask 64512   ;;  %vm491_vm2 = vcmask 31744   ;;  %s1075_s3 = inlined_call_operand.vmem [shape: bf16[8,4], index: 3, kind: input, shape index: {}]   ;;  %s1076_s0 = inlined_call_operand.vmem [shape: bf16[4,128,8], index: 0, kind: input, shape index: {}]   ;;  %s1077_s1 = inlined_call_operand.vmem [shape: f32[1,8], index: 1, kind: input, shape index: {}]   ;;  %s1078_s2 = inlined_call_operand.vmem [shape: f32[1,8], index: 2, kind: input, shape index: {}]   ;;  %s1079_s4 = inlined_call_operand.vmem [shape: f32[1,4], index: 4, kind: input, shape index: {}]   ;;  %s1080_s5 = inlined_call_operand.vmem [shape: f32[128,4], index: 5, kind: output, shape index: {}]  }
   0x1   :  { %v408_v0 = vld [vmem:[%s1075_s3] sm:$0xf]  ;;  %v697_v30 = vld [vmem:[%s1076_s0 + $0x10] sm:$0xff]  }
   0x2   :  { %v440_v1 = vsel %vm438_vm0, %v408_v0, 0  ;;  %v569_v2 = vld [vmem:[%s1076_s0] sm:$0xff]   ;;  %v705_v35 = vld [vmem:[%s1076_s0 + $0x50] sm:$0xff]   ;;  %v578_v43 = vunpack.c.l.bf16 %v697_v30  ;;  %v579_v44 = vunpack.c.h.bf16 %v697_v30 }
   0x3   :  { %v772_v3 = vld [vmem:[%s1077_s1] ss:$0 sm:$0xff]  ;;  %449 = vmatpush.bf16.msra.mxu0 %v440_v1  ;;  %727 = vmatpush.bf16.msra.mxu1 %v440_v1  ;;  %v570_v5 = vunpack.c.l.bf16 %v569_v2  ;;  %v571_v6 = vunpack.c.h.bf16 %v569_v2  ;;  %v713_v40 = vld [vmem:[%s1076_s0 + $0x90] sm:$0xff]   ;;  %v610_v47 = vunpack.c.l.bf16 %v705_v35  ;;  %v611_v48 = vunpack.c.h.bf16 %v705_v35 }
   0x4   :  { %v777_v4 = vld [vmem:[%s1078_s2] ss:$0 sm:$0xff]  ;;  %728 = vmatpush.bf16.msra.mxu2 %v440_v1  ;;  %729 = vmatpush.bf16.msra.mxu3 %v440_v1  ;;  %v62_v49 = vmul.f32 %v772_v3, %v578_v43  ;;  %v63_v50 = vmul.f32 %v772_v3, %v579_v44  ;;  %v642_v51 = vunpack.c.l.bf16 %v713_v40  ;;  %v643_v52 = vunpack.c.h.bf16 %v713_v40  ;;  %v721_v61 = vld [vmem:[%s1076_s0 + $0xd0] sm:$0xff]  }
   0x5   :  { %v703_v7 = vld [vmem:[%s1076_s0 + $0x40] sm:$0xff]   ;;  %v58_v14 = vmul.f32 %v772_v3, %v570_v5  ;;  %v59_v15 = vmul.f32 %v772_v3, %v571_v6  ;;  %v146_v55 = vmul.f32 %v772_v3, %v610_v47  ;;  %v147_v56 = vmul.f32 %v772_v3, %v611_v48  ;;  %v701_v44 = vld [vmem:[%s1076_s0 + $0x30] sm:$0xff]  }
   0x6   :  { %v711_v8 = vld [vmem:[%s1076_s0 + $0x80] sm:$0xff]   ;;  %v602_v10 = vunpack.c.l.bf16 %v703_v7  ;;  %v603_v11 = vunpack.c.h.bf16 %v703_v7  ;;  %v81_v57 = vadd.f32 %v777_v4, %v62_v49  ;;  %v82_v58 = vadd.f32 %v777_v4, %v63_v50 }
   0x7   :  { %v719_v9 = vld [vmem:[%s1076_s0 + $0xc0] sm:$0xff]   ;;  %v634_v12 = vunpack.c.l.bf16 %v711_v8  ;;  %v635_v13 = vunpack.c.h.bf16 %v711_v8  ;;  %v77_v22 = vadd.f32 %v777_v4, %v58_v14  ;;  %v78_v23 = vadd.f32 %v777_v4, %v59_v15 }
   0x8   :  { %v666_v16 = vunpack.c.l.bf16 %v719_v9  ;;  %v667_v17 = vunpack.c.h.bf16 %v719_v9  ;;  %v142_v18 = vmul.f32 %v772_v3, %v602_v10  ;;  %v143_v19 = vmul.f32 %v772_v3, %v603_v11  ;;  %v699_v2 = vld [vmem:[%s1076_s0 + $0x20] sm:$0xff]  }
   0x9   :  { %v239_v20 = vmul.f32 %v772_v3, %v634_v12  ;;  %v240_v21 = vmul.f32 %v772_v3, %v635_v13  ;;  %v93_v31 = vmax.f32 %v77_v22, 0.0  ;;  %v94_v32 = vmax.f32 %v78_v23, 0.0  ;;  %v707_v13 = vld [vmem:[%s1076_s0 + $0x60] sm:$0xff]  }
   0xa   :  { %v336_v24 = vmul.f32 %v772_v3, %v666_v16  ;;  %v337_v25 = vmul.f32 %v772_v3, %v667_v17  ;;  %v158_v26 = vadd.f32 %v777_v4, %v142_v18  ;;  %v159_v27 = vadd.f32 %v777_v4, %v143_v19 }
   0xb   :  { %v255_v28 = vadd.f32 %v777_v4, %v239_v20  ;;  %v256_v29 = vadd.f32 %v777_v4, %v240_v21  ;;  %v243_v59 = vmul.f32 %v772_v3, %v642_v51  ;;  %v244_v60 = vmul.f32 %v772_v3, %v643_v52 }
   0xc   :  { %v352_v33 = vadd.f32 %v777_v4, %v336_v24  ;;  %v353_v34 = vadd.f32 %v777_v4, %v337_v25  ;;  %v174_v36 = vmax.f32 %v158_v26, 0.0  ;;  %v175_v37 = vmax.f32 %v159_v27, 0.0  ;;  %v715_v26 = vld [vmem:[%s1076_s0 + $0xa0] sm:$0xff]  }
   0xd   :  { %v271_v38 = vmax.f32 %v255_v28, 0.0  ;;  %v272_v39 = vmax.f32 %v256_v29, 0.0  ;;  %v162_v0 = vadd.f32 %v777_v4, %v146_v55  ;;  %v163_v1 = vadd.f32 %v777_v4, %v147_v56 }
   0xe   :  { %v368_v41 = vmax.f32 %v352_v33, 0.0  ;;  %v369_v42 = vmax.f32 %v353_v34, 0.0  ;;  %v190_v45 = vadd.f32 %v174_v36, %v93_v31  ;;  %v191_v46 = vadd.f32 %v175_v37, %v94_v32 }
   0xf   :  { %v97_v5 = vmax.f32 %v81_v57, 0.0  ;;  %v98_v6 = vmax.f32 %v82_v58, 0.0  ;;  %v259_v7 = vadd.f32 %v777_v4, %v243_v59  ;;  %v260_v8 = vadd.f32 %v777_v4, %v244_v60  ;;  %v709_v57 = vld [vmem:[%s1076_s0 + $0x70] sm:$0xff]  }
  0x10   :  { %v287_v53 = vadd.f32 %v271_v38, %v190_v45  ;;  %v288_v54 = vadd.f32 %v272_v39, %v191_v46  ;;  %v178_v10 = vmax.f32 %v162_v0, 0.0  ;;  %v179_v11 = vmax.f32 %v163_v1, 0.0  ;;  %v723_v39 = vld [vmem:[%s1076_s0 + $0xe0] sm:$0xff]  }
  0x11   :  { %v674_v12 = vunpack.c.l.bf16 %v721_v61  ;;  %v275_v14 = vmax.f32 %v259_v7, 0.0  ;;  %v276_v15 = vmax.f32 %v260_v8, 0.0  ;;  %v675_v16 = vunpack.c.h.bf16 %v721_v61  ;;  %v717_v8 = vld [vmem:[%s1076_s0 + $0xb0] sm:$0xff]  }
  0x12   :  { %v384_v62 = vadd.f32 %v368_v41, %v287_v53  ;;  %v385_v63 = vadd.f32 %v369_v42, %v288_v54  ;;  %v586_v17 = vunpack.c.l.bf16 %v699_v2  ;;  %v194_v18 = vadd.f32 %v178_v10, %v97_v5 }
  0x13   :  { %v195_v19 = vadd.f32 %v179_v11, %v98_v6  ;;  %v340_v20 = vmul.f32 %v772_v3, %v674_v12  ;;  %v587_v21 = vunpack.c.h.bf16 %v699_v2  ;;  %v341_v22 = vmul.f32 %v772_v3, %v675_v16 }
  0x14   :  { %v400_v9 = vpack.c.bf16 %v385_v63, %v384_v62  ;;  %v66_v23 = vmul.f32 %v772_v3, %v586_v17  ;;  %v618_v24 = vunpack.c.l.bf16 %v707_v13  ;;  %v619_v25 = vunpack.c.h.bf16 %v707_v13 }
  0x15   :  { %v291_v27 = vadd.f32 %v275_v14, %v194_v18  ;;  %v292_v28 = vadd.f32 %v276_v15, %v195_v19  ;;  %v356_v29 = vadd.f32 %v777_v4, %v340_v20  ;;  %v67_v30 = vmul.f32 %v772_v3, %v587_v21  ;;  %v725_v21 = vld [vmem:[%s1076_s0 + $0xf0] sm:$0xff]  }
  0x16   :  { %560 = vmatmul.msk.bf16.vlgmr.msra.gmra.mxu0 %vm413_vm1, %v400_v9  ;;  %v357_v31 = vadd.f32 %v777_v4, %v341_v22  ;;  %v85_v32 = vadd.f32 %v777_v4, %v66_v23  ;;  %v150_v33 = vmul.f32 %v772_v3, %v618_v24  ;;  %v151_v34 = vmul.f32 %v772_v3, %v619_v25 }
  0x17   :  { %v372_v35 = vmax.f32 %v356_v29, 0.0  ;;  %v86_v36 = vadd.f32 %v777_v4, %v67_v30  ;;  %v650_v37 = vunpack.c.l.bf16 %v715_v26  ;;  %v651_v38 = vunpack.c.h.bf16 %v715_v26  ;;  %v696_v26 = vld [vmem:[%s1076_s0 + $0x8] sm:$0xff]  }
  0x18   :  { %v373_v40 = vmax.f32 %v357_v31, 0.0  ;;  %v101_v41 = vmax.f32 %v85_v32, 0.0  ;;  %v166_v42 = vadd.f32 %v777_v4, %v150_v33  ;;  %v167_v43 = vadd.f32 %v777_v4, %v151_v34 }
  0x19   :  { %v388_v45 = vadd.f32 %v372_v35, %v291_v27  ;;  %v102_v46 = vmax.f32 %v86_v36, 0.0  ;;  %v247_v47 = vmul.f32 %v772_v3, %v650_v37  ;;  %v248_v48 = vmul.f32 %v772_v3, %v651_v38 }
  0x1a   :  { %v389_v49 = vadd.f32 %v373_v40, %v292_v28  ;;  %v182_v50 = vmax.f32 %v166_v42, 0.0  ;;  %v183_v51 = vmax.f32 %v167_v43, 0.0  ;;  %v682_v52 = vunpack.c.l.bf16 %v723_v39 }
  0x1b   :  { %v263_v53 = vadd.f32 %v777_v4, %v247_v47  ;;  %v264_v54 = vadd.f32 %v777_v4, %v248_v48  ;;  %v683_v55 = vunpack.c.h.bf16 %v723_v39  ;;  %v594_v56 = vunpack.c.l.bf16 %v701_v44  ;;  %v704_v39 = vld [vmem:[%s1076_s0 + $0x48] sm:$0xff]  }
  0x1c   :  { %v402_v58 = vpack.c.bf16 %v389_v49, %v388_v45  ;;  %v198_v59 = vadd.f32 %v182_v50, %v101_v41  ;;  %v199_v60 = vadd.f32 %v183_v51, %v102_v46  ;;  %v344_v61 = vmul.f32 %v772_v3, %v682_v52  ;;  %v712_v52 = vld [vmem:[%s1076_s0 + $0x88] sm:$0xff]  }
  0x1d   :  { %v279_v62 = vmax.f32 %v263_v53, 0.0  ;;  %v280_v63 = vmax.f32 %v264_v54, 0.0  ;;  %v345_v0 = vmul.f32 %v772_v3, %v683_v55  ;;  %v595_v1 = vunpack.c.h.bf16 %v701_v44 }
  0x1e   :  { %562 = vmatmul.msk.bf16.vlgmr.msra.gmra.mxu1 %vm413_vm1, %v402_v58  ;;  %v360_v2 = vadd.f32 %v777_v4, %v344_v61  ;;  %v70_v5 = vmul.f32 %v772_v3, %v594_v56  ;;  %v626_v6 = vunpack.c.l.bf16 %v709_v57  ;;  %v627_v7 = vunpack.c.h.bf16 %v709_v57  ;;  %v720_v61 = vld [vmem:[%s1076_s0 + $0xc8] sm:$0xff]  }
  0x1f   :  { %v295_v9 = vadd.f32 %v279_v62, %v198_v59  ;;  %v296_v10 = vadd.f32 %v280_v63, %v199_v60  ;;  %v361_v11 = vadd.f32 %v777_v4, %v345_v0  ;;  %v71_v12 = vmul.f32 %v772_v3, %v595_v1 }
  0x20   :  { %v376_v13 = vmax.f32 %v360_v2, 0.0  ;;  %v89_v14 = vadd.f32 %v777_v4, %v70_v5  ;;  %v154_v15 = vmul.f32 %v772_v3, %v626_v6  ;;  %v155_v16 = vmul.f32 %v772_v3, %v627_v7 }
  0x21   :  { %v377_v17 = vmax.f32 %v361_v11, 0.0  ;;  %v90_v18 = vadd.f32 %v777_v4, %v71_v12  ;;  %v658_v19 = vunpack.c.l.bf16 %v717_v8  ;;  %v659_v20 = vunpack.c.h.bf16 %v717_v8  ;;  %v698_v8 = vld [vmem:[%s1076_s0 + $0x18] sm:$0xff]  }
  0x22   :  { %v392_v22 = vadd.f32 %v376_v13, %v295_v9  ;;  %v105_v23 = vmax.f32 %v89_v14, 0.0  ;;  %v170_v24 = vadd.f32 %v777_v4, %v154_v15  ;;  %v171_v25 = vadd.f32 %v777_v4, %v155_v16 }
  0x23   :  { %v393_v27 = vadd.f32 %v377_v17, %v296_v10  ;;  %v106_v28 = vmax.f32 %v90_v18, 0.0  ;;  %v251_v29 = vmul.f32 %v772_v3, %v658_v19  ;;  %v252_v30 = vmul.f32 %v772_v3, %v659_v20 }
  0x24   :  { %v186_v31 = vmax.f32 %v170_v24, 0.0  ;;  %v187_v32 = vmax.f32 %v171_v25, 0.0  ;;  %v690_v33 = vunpack.c.l.bf16 %v725_v21  ;;  %v691_v34 = vunpack.c.h.bf16 %v725_v21  ;;  %v706_v21 = vld [vmem:[%s1076_s0 + $0x58] sm:$0xff]  }
  0x25   :  { %v404_v35 = vpack.c.bf16 %v393_v27, %v392_v22  ;;  %v267_v36 = vadd.f32 %v777_v4, %v251_v29  ;;  %v268_v37 = vadd.f32 %v777_v4, %v252_v30  ;;  %v574_v38 = vunpack.c.l.bf16 %v696_v26 }
  0x26   :  { %v202_v40 = vadd.f32 %v186_v31, %v105_v23  ;;  %v203_v41 = vadd.f32 %v187_v32, %v106_v28  ;;  %v348_v42 = vmul.f32 %v772_v3, %v690_v33  ;;  %v349_v43 = vmul.f32 %v772_v3, %v691_v34  ;;  %v714_v34 = vld [vmem:[%s1076_s0 + $0x98] sm:$0xff]  }
  0x27   :  { %564 = vmatmul.msk.bf16.vlgmr.msra.gmra.mxu2 %vm413_vm1, %v404_v35  ;;  %v283_v44 = vmax.f32 %v267_v36, 0.0  ;;  %v284_v45 = vmax.f32 %v268_v37, 0.0  ;;  %v575_v46 = vunpack.c.h.bf16 %v696_v26  ;;  %v60_v47 = vmul.f32 %v772_v3, %v574_v38 }
  0x28   :  { %v364_v48 = vadd.f32 %v777_v4, %v348_v42  ;;  %v365_v49 = vadd.f32 %v777_v4, %v349_v43  ;;  %v606_v50 = vunpack.c.l.bf16 %v704_v39  ;;  %v607_v51 = vunpack.c.h.bf16 %v704_v39  ;;  %v722_v43 = vld [vmem:[%s1076_s0 + $0xd8] sm:$0xff]  }
  0x29   :  { %v299_v53 = vadd.f32 %v283_v44, %v202_v40  ;;  %v300_v54 = vadd.f32 %v284_v45, %v203_v41  ;;  %v61_v55 = vmul.f32 %v772_v3, %v575_v46  ;;  %v79_v56 = vadd.f32 %v777_v4, %v60_v47 }
  0x2a   :  { %v380_v57 = vmax.f32 %v364_v48, 0.0  ;;  %v381_v58 = vmax.f32 %v365_v49, 0.0  ;;  %v144_v59 = vmul.f32 %v772_v3, %v606_v50  ;;  %v145_v60 = vmul.f32 %v772_v3, %v607_v51  ;;  %v700_v48 = vld [vmem:[%s1076_s0 + $0x28] sm:$0xff]  }
  0x2b   :  { %v80_v62 = vadd.f32 %v777_v4, %v61_v55  ;;  %v95_v63 = vmax.f32 %v79_v56, 0.0  ;;  %v638_v0 = vunpack.c.l.bf16 %v712_v52  ;;  %v639_v1 = vunpack.c.h.bf16 %v712_v52 }
  0x2c   :  { %v396_v2 = vadd.f32 %v380_v57, %v299_v53  ;;  %v397_v5 = vadd.f32 %v381_v58, %v300_v54  ;;  %v160_v6 = vadd.f32 %v777_v4, %v144_v59  ;;  %v161_v7 = vadd.f32 %v777_v4, %v145_v60 }
  0x2d   :  { %v96_v9 = vmax.f32 %v80_v62, 0.0  ;;  %v241_v10 = vmul.f32 %v772_v3, %v638_v0  ;;  %v242_v11 = vmul.f32 %v772_v3, %v639_v1  ;;  %v670_v12 = vunpack.c.l.bf16 %v720_v61  ;;  %v708_v1 = vld [vmem:[%s1076_s0 + $0x68] sm:$0xff]  }
  0x2e   :  { %v406_v13 = vpack.c.bf16 %v397_v5, %v396_v2  ;;  %v176_v14 = vmax.f32 %v160_v6, 0.0  ;;  %v177_v15 = vmax.f32 %v161_v7, 0.0  ;;  %v671_v16 = vunpack.c.h.bf16 %v720_v61 }
  0x2f   :  { %v257_v17 = vadd.f32 %v777_v4, %v241_v10  ;;  %v258_v18 = vadd.f32 %v777_v4, %v242_v11  ;;  %v338_v19 = vmul.f32 %v772_v3, %v670_v12  ;;  %v582_v20 = vunpack.c.l.bf16 %v698_v8 }
  0x30   :  { %566 = vmatmul.msk.bf16.vlgmr.msra.gmra.mxu3 %vm413_vm1, %v406_v13  ;;  %v192_v22 = vadd.f32 %v176_v14, %v95_v63  ;;  %v193_v23 = vadd.f32 %v177_v15, %v96_v9  ;;  %v339_v24 = vmul.f32 %v772_v3, %v671_v16  ;;  %v583_v25 = vunpack.c.h.bf16 %v698_v8  ;;  %v716_v16 = vld [vmem:[%s1076_s0 + $0xa8] sm:$0xff]  }
  0x31   :  { %v273_v26 = vmax.f32 %v257_v17, 0.0  ;;  %v274_v27 = vmax.f32 %v258_v18, 0.0  ;;  %v354_v28 = vadd.f32 %v777_v4, %v338_v19  ;;  %v64_v29 = vmul.f32 %v772_v3, %v582_v20 }
  0x32   :  { %v355_v30 = vadd.f32 %v777_v4, %v339_v24  ;;  %v65_v31 = vmul.f32 %v772_v3, %v583_v25  ;;  %v614_v32 = vunpack.c.l.bf16 %v706_v21  ;;  %v615_v33 = vunpack.c.h.bf16 %v706_v21  ;;  %v724_v21 = vld [vmem:[%s1076_s0 + $0xe8] sm:$0xff]  }
  0x33   :  { %v289_v35 = vadd.f32 %v273_v26, %v192_v22  ;;  %v290_v36 = vadd.f32 %v274_v27, %v193_v23  ;;  %v370_v37 = vmax.f32 %v354_v28, 0.0  ;;  %v83_v38 = vadd.f32 %v777_v4, %v64_v29 }
  0x34   :  { %v371_v39 = vmax.f32 %v355_v30, 0.0  ;;  %v84_v40 = vadd.f32 %v777_v4, %v65_v31  ;;  %v148_v41 = vmul.f32 %v772_v3, %v614_v32  ;;  %v149_v42 = vmul.f32 %v772_v3, %v615_v33  ;;  %v702_v30 = vld [vmem:[%s1076_s0 + $0x38] sm:$0xff]  }
  0x35   :  { %v386_v44 = vadd.f32 %v370_v37, %v289_v35  ;;  %v99_v45 = vmax.f32 %v83_v38, 0.0  ;;  %v646_v46 = vunpack.c.l.bf16 %v714_v34  ;;  %v647_v47 = vunpack.c.h.bf16 %v714_v34 }
  0x36   :  { %v387_v49 = vadd.f32 %v371_v39, %v290_v36  ;;  %v100_v50 = vmax.f32 %v84_v40, 0.0  ;;  %v164_v51 = vadd.f32 %v777_v4, %v148_v41  ;;  %v165_v52 = vadd.f32 %v777_v4, %v149_v42 }
  0x37   :  { %v245_v53 = vmul.f32 %v772_v3, %v646_v46  ;;  %v246_v54 = vmul.f32 %v772_v3, %v647_v47  ;;  %v678_v55 = vunpack.c.l.bf16 %v722_v43  ;;  %v679_v56 = vunpack.c.h.bf16 %v722_v43  ;;  %v710_v47 = vld [vmem:[%s1076_s0 + $0x78] sm:$0xff]  }
  0x38   :  { %v401_v57 = vpack.c.bf16 %v387_v49, %v386_v44  ;;  %v180_v58 = vmax.f32 %v164_v51, 0.0  ;;  %v181_v59 = vmax.f32 %v165_v52, 0.0  ;;  %v590_v60 = vunpack.c.l.bf16 %v700_v48 }
  0x39   :  { %v261_v61 = vadd.f32 %v777_v4, %v245_v53  ;;  %v262_v62 = vadd.f32 %v777_v4, %v246_v54  ;;  %v342_v63 = vmul.f32 %v772_v3, %v678_v55  ;;  %v343_v0 = vmul.f32 %v772_v3, %v679_v56  ;;  %v718_v56 = vld [vmem:[%s1076_s0 + $0xb8] sm:$0xff]  }
  0x3a   :  { %561 = vmatmul.msk.bf16.gmra.mxu0 %vm413_vm1, %v401_v57  ;;  %v196_v2 = vadd.f32 %v180_v58, %v99_v45  ;;  %v197_v5 = vadd.f32 %v181_v59, %v100_v50  ;;  %v591_v6 = vunpack.c.h.bf16 %v700_v48  ;;  %v68_v7 = vmul.f32 %v772_v3, %v590_v60 }
  0x3b   :  { %v277_v8 = vmax.f32 %v261_v61, 0.0  ;;  %v278_v9 = vmax.f32 %v262_v62, 0.0  ;;  %v358_v10 = vadd.f32 %v777_v4, %v342_v63  ;;  %v359_v11 = vadd.f32 %v777_v4, %v343_v0 }
  0x3c   :  { %v69_v12 = vmul.f32 %v772_v3, %v591_v6  ;;  %v87_v13 = vadd.f32 %v777_v4, %v68_v7  ;;  %v622_v14 = vunpack.c.l.bf16 %v708_v1  ;;  %v623_v15 = vunpack.c.h.bf16 %v708_v1  ;;  %v726_v1 = vld [vmem:[%s1076_s0 + $0xf8] sm:$0xff]  }
  0x3d   :  { %v293_v17 = vadd.f32 %v277_v8, %v196_v2  ;;  %v294_v18 = vadd.f32 %v278_v9, %v197_v5  ;;  %v374_v19 = vmax.f32 %v358_v10, 0.0  ;;  %v375_v20 = vmax.f32 %v359_v11, 0.0 }
  0x3e   :  { %v88_v22 = vadd.f32 %v777_v4, %v69_v12  ;;  %v103_v23 = vmax.f32 %v87_v13, 0.0  ;;  %v152_v24 = vmul.f32 %v772_v3, %v622_v14  ;;  %v153_v25 = vmul.f32 %v772_v3, %v623_v15 }
  0x3f   :  { %v390_v26 = vadd.f32 %v374_v19, %v293_v17  ;;  %v391_v27 = vadd.f32 %v375_v20, %v294_v18  ;;  %v654_v28 = vunpack.c.l.bf16 %v716_v16  ;;  %v655_v29 = vunpack.c.h.bf16 %v716_v16 }
  0x40   :  { %v104_v31 = vmax.f32 %v88_v22, 0.0  ;;  %v168_v32 = vadd.f32 %v777_v4, %v152_v24  ;;  %v169_v33 = vadd.f32 %v777_v4, %v153_v25  ;;  %v686_v34 = vunpack.c.l.bf16 %v724_v21 }
  0x41   :  { %v403_v35 = vpack.c.bf16 %v391_v27, %v390_v26  ;;  %v249_v36 = vmul.f32 %v772_v3, %v654_v28  ;;  %v250_v37 = vmul.f32 %v772_v3, %v655_v29  ;;  %v687_v38 = vunpack.c.h.bf16 %v724_v21 }
  0x42   :  { %v184_v39 = vmax.f32 %v168_v32, 0.0  ;;  %v185_v40 = vmax.f32 %v169_v33, 0.0  ;;  %v346_v41 = vmul.f32 %v772_v3, %v686_v34  ;;  %v598_v42 = vunpack.c.l.bf16 %v702_v30 }
  0x43   :  { %563 = vmatmul.msk.bf16.gmra.mxu1 %vm413_vm1, %v403_v35  ;;  %v265_v43 = vadd.f32 %v777_v4, %v249_v36  ;;  %v266_v44 = vadd.f32 %v777_v4, %v250_v37  ;;  %v347_v45 = vmul.f32 %v772_v3, %v687_v38  ;;  %v599_v46 = vunpack.c.h.bf16 %v702_v30 }
  0x44   :  { %v200_v48 = vadd.f32 %v184_v39, %v103_v23  ;;  %v201_v49 = vadd.f32 %v185_v40, %v104_v31  ;;  %v362_v50 = vadd.f32 %v777_v4, %v346_v41  ;;  %v72_v51 = vmul.f32 %v772_v3, %v598_v42 }
  0x45   :  { %v281_v52 = vmax.f32 %v265_v43, 0.0  ;;  %v282_v53 = vmax.f32 %v266_v44, 0.0  ;;  %v363_v54 = vadd.f32 %v777_v4, %v347_v45  ;;  %v73_v55 = vmul.f32 %v772_v3, %v599_v46 }
  0x46   :  { %v378_v57 = vmax.f32 %v362_v50, 0.0  ;;  %v91_v58 = vadd.f32 %v777_v4, %v72_v51  ;;  %v630_v59 = vunpack.c.l.bf16 %v710_v47  ;;  %v631_v60 = vunpack.c.h.bf16 %v710_v47 }
  0x47   :  { %v297_v61 = vadd.f32 %v281_v52, %v200_v48  ;;  %v298_v62 = vadd.f32 %v282_v53, %v201_v49  ;;  %v379_v63 = vmax.f32 %v363_v54, 0.0  ;;  %v92_v0 = vadd.f32 %v777_v4, %v73_v55 }
  0x48   :  { %v107_v2 = vmax.f32 %v91_v58, 0.0  ;;  %v156_v5 = vmul.f32 %v772_v3, %v630_v59  ;;  %v157_v6 = vmul.f32 %v772_v3, %v631_v60  ;;  %v662_v7 = vunpack.c.l.bf16 %v718_v56 }
  0x49   :  { %v394_v8 = vadd.f32 %v378_v57, %v297_v61  ;;  %v395_v9 = vadd.f32 %v379_v63, %v298_v62  ;;  %v108_v10 = vmax.f32 %v92_v0, 0.0  ;;  %v663_v11 = vunpack.c.h.bf16 %v718_v56 }
  0x4a   :  { %v172_v12 = vadd.f32 %v777_v4, %v156_v5  ;;  %v173_v13 = vadd.f32 %v777_v4, %v157_v6  ;;  %v253_v14 = vmul.f32 %v772_v3, %v662_v7  ;;  %v694_v15 = vunpack.c.l.bf16 %v726_v1 }
  0x4b   :  { %v405_v16 = vpack.c.bf16 %v395_v9, %v394_v8  ;;  %v254_v17 = vmul.f32 %v772_v3, %v663_v11  ;;  %v695_v18 = vunpack.c.h.bf16 %v726_v1 }
  0x4c   :  { %v188_v19 = vmax.f32 %v172_v12, 0.0  ;;  %v189_v20 = vmax.f32 %v173_v13, 0.0  ;;  %v269_v21 = vadd.f32 %v777_v4, %v253_v14  ;;  %v350_v22 = vmul.f32 %v772_v3, %v694_v15 }
  0x4d   :  { %565 = vmatmul.msk.bf16.gmra.mxu2 %vm413_vm1, %v405_v16  ;;  %v270_v23 = vadd.f32 %v777_v4, %v254_v17  ;;  %v351_v24 = vmul.f32 %v772_v3, %v695_v18  ;;  %v732_v3 = vld [vmem:[%s1079_s4] ss:$0 sm:$0xff] }
  0x4e   :  { %v204_v25 = vadd.f32 %v188_v19, %v107_v2  ;;  %v205_v26 = vadd.f32 %v189_v20, %v108_v10  ;;  %v285_v27 = vmax.f32 %v269_v21, 0.0  ;;  %v366_v28 = vadd.f32 %v777_v4, %v350_v22 }
  0x4f   :  { %v286_v29 = vmax.f32 %v270_v23, 0.0  ;;  %v367_v30 = vadd.f32 %v777_v4, %v351_v24 }
  0x50   :  { %v301_v31 = vadd.f32 %v285_v27, %v204_v25  ;;  %v382_v32 = vmax.f32 %v366_v28, 0.0 }
  0x51   :  { %v302_v33 = vadd.f32 %v286_v29, %v205_v26  ;;  %v383_v34 = vmax.f32 %v367_v30, 0.0 }
  0x52   :  { %v398_v35 = vadd.f32 %v382_v32, %v301_v31 }
  0x53   :  { %v399_v36 = vadd.f32 %v383_v34, %v302_v33 }
  0x55   :  { %v407_v37 = vpack.c.bf16 %v399_v36, %v398_v35 }
  0x57   :  { %567 = vmatmul.msk.bf16.gmra.mxu3 %vm413_vm1, %v407_v37 }
  0x93   :  { %v451_v38 = vpop.f32.mrf.mxu0 }
  0x94   :  { %v452_v39 = vadd.f32 %v732_v3, %v451_v38 }
  0x96   :  { %492 = vst.msk [vmem:[%s1080_s5] sm:$0xff] %vm491_vm2, %v452_v39 }
  0x9b   :  { %v453_v4 = vpop.f32.mrf.mxu0  ;;  %v461_v41 = vpop.f32.mrf.mxu1 }
  0x9c   :  { %v454_v40 = vadd.f32 %v732_v3, %v453_v4  ;;  %v462_v42 = vadd.f32 %v732_v3, %v461_v41 }
  0x9e   :  { %493 = vst.msk [vmem:[%s1080_s5 + $0x8] sm:$0xff] %vm491_vm2, %v454_v40 }
  0x9f   :  { %496 = vst.msk [vmem:[%s1080_s5 + $0x20] sm:$0xff] %vm491_vm2, %v462_v42 }
  0xa3   :  { %v463_v43 = vpop.f32.mrf.mxu1 }
  0xa4   :  { %v464_v44 = vadd.f32 %v732_v3, %v463_v43 }
  0xa6   :  { %497 = vst.msk [vmem:[%s1080_s5 + $0x28] sm:$0xff] %vm491_vm2, %v464_v44 }
  0xaa   :  { %v471_v45 = vpop.f32.mrf.mxu2 }
  0xab   :  { %v472_v46 = vadd.f32 %v732_v3, %v471_v45 }
  0xad   :  { %500 = vst.msk [vmem:[%s1080_s5 + $0x40] sm:$0xff] %vm491_vm2, %v472_v46 }
  0xb2   :  { %v473_v47 = vpop.f32.mrf.mxu2 }
  0xb3   :  { %v481_v48 = vpop.f32.mrf.mxu3  ;;  %v474_v49 = vadd.f32 %v732_v3, %v473_v47 }
  0xb4   :  { %v482_v50 = vadd.f32 %v732_v3, %v481_v48 }
  0xb5   :  { %501 = vst.msk [vmem:[%s1080_s5 + $0x48] sm:$0xff] %vm491_vm2, %v474_v49 }
  0xb6   :  { %504 = vst.msk [vmem:[%s1080_s5 + $0x60] sm:$0xff] %vm491_vm2, %v482_v50 }
  0xb7   :  { %v456_v51 = vpop.f32.mrf.mxu0 }
  0xb8   :  { %v457_v52 = vadd.f32 %v732_v3, %v456_v51 }
  0xba   :  { %494 = vst.msk [vmem:[%s1080_s5 + $0x10] sm:$0xff] %vm491_vm2, %v457_v52 }
  0xbb   :  { %v483_v53 = vpop.f32.mrf.mxu3 }
  0xbc   :  { %v484_v54 = vadd.f32 %v732_v3, %v483_v53 }
  0xbe   :  { %505 = vst.msk [vmem:[%s1080_s5 + $0x68] sm:$0xff] %vm491_vm2, %v484_v54 }
  0xbf   :  { %v458_v55 = vpop.f32.mrf.mxu0 }
  0xc0   :  { %v466_v56 = vpop.f32.mrf.mxu1  ;;  %v459_v57 = vadd.f32 %v732_v3, %v458_v55 }
  0xc1   :  { %v467_v58 = vadd.f32 %v732_v3, %v466_v56 }
  0xc2   :  { %495 = vst.msk [vmem:[%s1080_s5 + $0x18] sm:$0xff] %vm491_vm2, %v459_v57 }
  0xc3   :  { %498 = vst.msk [vmem:[%s1080_s5 + $0x30] sm:$0xff] %vm491_vm2, %v467_v58 }
  0xc8   :  { %v468_v59 = vpop.f32.mrf.mxu1 }
  0xc9   :  { %v469_v60 = vadd.f32 %v732_v3, %v468_v59 }
  0xcb   :  { %499 = vst.msk [vmem:[%s1080_s5 + $0x38] sm:$0xff] %vm491_vm2, %v469_v60 }
  0xd0   :  { %v476_v61 = vpop.f32.mrf.mxu2 }
  0xd1   :  { %v477_v62 = vadd.f32 %v732_v3, %v476_v61 }
  0xd3   :  { %502 = vst.msk [vmem:[%s1080_s5 + $0x50] sm:$0xff] %vm491_vm2, %v477_v62 }
  0xd8   :  { %v478_v63 = vpop.f32.mrf.mxu2 }
  0xd9   :  { %v479_v0 = vadd.f32 %v732_v3, %v478_v63 }
  0xda   :  { %v486_v1 = vpop.f32.mrf.mxu3 }
  0xdb   :  { %v487_v2 = vadd.f32 %v732_v3, %v486_v1  ;;  %503 = vst.msk [vmem:[%s1080_s5 + $0x58] sm:$0xff] %vm491_vm2, %v479_v0 }
  0xdd   :  { %506 = vst.msk [vmem:[%s1080_s5 + $0x70] sm:$0xff] %vm491_vm2, %v487_v2 }
  0xe2   :  { %v488_v5 = vpop.f32.mrf.mxu3 }
  0xe3   :  { %v489_v6 = vadd.f32 %v732_v3, %v488_v5 }
  0xe5   :  { %507 = vst.msk [vmem:[%s1080_s5 + $0x78] sm:$0xff] %vm491_vm2, %v489_v6 }

</bundles_post_ra>
